<compile_context>
chip_gen: v7x
topology: tpu7x:2x2x1
jax: 0.10.0
libtpu: 0.0.40
codegen_flags: <defaults>
</compile_context>

<pallas_src>
import functools

import jax
import jax.numpy as jnp
from jax.experimental import pallas as pl
from jax.experimental.pallas import tpu as pltpu


_SUBLANE_F32 = 8          # f32 second-minor alignment
_MAX_BATCH_TILE = 512     # default rows per grid step (amortizes step overhead)
_MIN_BATCH_TILE = 64      # don't go below this when splitting for megacore


def _round_up(x, m):
    return ((x + m - 1) // m) * m


# --------------------------------------------------------------------------
# Fused multi-layer kernel: one batch tile per grid step, all layers inside.
# --------------------------------------------------------------------------
def _fused_mlp_kernel(*refs, n_layers, relu_flags):
    # refs = (x_ref, w0, b0, w1, b1, ..., w_{L-1}, b_{L-1}, o_ref)
    x_ref = refs[0]
    o_ref = refs[-1]
    wb = refs[1:-1]

    h = x_ref[...].astype(jnp.bfloat16)              # (tb, K0) bf16 MXU input
    for li in range(n_layers):                       # Python-unrolled layers
        w = wb[2 * li][...]                          # bf16 (Kin, Kout), VMEM-resident
        b = wb[2 * li + 1][...]                      # f32  (1, Kout),  VMEM-resident
        y = jnp.dot(h, w, preferred_element_type=jnp.float32) + b
        if relu_flags[li]:
            y = jnp.maximum(y, 0.0)
        if li < n_layers - 1:
            h = y.astype(jnp.bfloat16)               # next layer's MXU input
        else:
            o_ref[...] = y.astype(o_ref.dtype)


# --------------------------------------------------------------------------
# Parameter construction (torch-equivalent, f32).
# --------------------------------------------------------------------------
def orthogonal(key, rows, cols, dtype=jnp.float32):
    """Deterministic orthogonal init matching torch.nn.init.orthogonal_
    shape semantics for a (rows, cols) weight."""
    transpose = rows < cols
    r, c = (cols, rows) if transpose else (rows, cols)
    a = jax.random.normal(key, (r, c), dtype=jnp.float32)
    q, rmat = jnp.linalg.qr(a)
    d = jnp.sign(jnp.diagonal(rmat))
    q = q * d[None, :]
    if transpose:
        q = q.T
    return q.astype(dtype)


def init_mlp_params(key, input_dim, hidden_dim, output_dim, hidden_depth):
    """Returns list of (W_T (in,out) f32, b (out,) f32, apply_relu) per layer."""
    if hidden_depth == 0:
        dims = [(input_dim, output_dim, False)]
    else:
        dims = [(input_dim, hidden_dim, True)]
        for _ in range(hidden_depth - 1):
            dims.append((hidden_dim, hidden_dim, True))
        dims.append((hidden_dim, output_dim, False))

    layers = []
    keys = jax.random.split(key, len(dims))
    for k, (din, dout, relu) in zip(keys, dims):
        w = orthogonal(k, dout, din)            # torch weight shape (out, in)
        w_t = w.T                               # (in, out) so y = x @ W.T
        b = jnp.zeros((dout,), jnp.float32)     # weight_init fills bias with 0
        layers.append((w_t, b, relu))
    return layers


def prepare_mlp_params(params):
    """One-time prep: cast MXU operands to bf16 (biases stay f32 for the
    f32-accumulator epilogue).  No padding: everything is VMEM-resident and
    the kernel reads/writes unpadded HBM arrays, so padding would only add
    HBM traffic."""
    weights, biases, relu_flags = [], [], []
    for w_t, b, relu in params:
        weights.append(w_t.astype(jnp.bfloat16))          # (in, out)
        biases.append(b.reshape(1, -1).astype(jnp.float32))  # (1, out)
        relu_flags.append(bool(relu))
    return dict(
        weights=weights,
        biases=biases,
        relu_flags=tuple(relu_flags),
        input_dim=params[0][0].shape[0],
        output_dim=params[-1][0].shape[1],
    )


# --------------------------------------------------------------------------
# Tile / VMEM-budget helpers.
# --------------------------------------------------------------------------
def _choose_batch_tile(B, max_tile):
    """Prefer >=2-4 grid steps for large B (so the 'parallel' axis shards
    across the two TensorCores on v7x), but never tiles below ~64 rows
    (per-step overhead) or above max_tile, sublane aligned."""
    full = _round_up(B, _SUBLANE_F32)
    tb = _round_up(-(-B // 4), _SUBLANE_F32)      # ~B/4, sublane aligned
    tb = max(tb, _MIN_BATCH_TILE)
    tb = min(tb, max_tile, full)
    return tb


def _vmem_limit_bytes(weights, biases, tb, in_dim, out_dim, single_buffer):
    """Computed VMEM budget: resident params (+x buffer count), double-buffered
    x / out tiles, activation temporaries, headroom — capped to ~3/4 of the
    chip's physical VMEM (≈48 MiB on v7x, ≈96 MiB on v5e/v6e)."""
    resident = (sum(int(w.size) * 2 for w in weights)
                + sum(int(b.size) * 4 for b in biases))
    resident *= 1 if single_buffer else 2
    io = 2 * tb * (in_dim * 4 + out_dim * 4)      # double-buffered x / out tiles
    widest = max(int(w.shape[1]) for w in weights)
    act = 3 * tb * widest * 4                     # f32 accumulator + bf16 copies
    budget = resident + io + act + (4 << 20)      # headroom
    try:
        cap = int(getattr(pltpu.get_tpu_info(), "vmem_capacity_bytes", 64 << 20))
    except Exception:
        cap = 64 << 20                            # assume smallest (v7x per-TC)
    return min(max(budget, 32 << 20), (cap * 3) // 4)
    # TODO(synk): if resident params ever exceed the VMEM cap (very large
    # hidden_dim), fall back to a K/N-tiled grid with an f32 accumulator
    # instead of fully VMEM-resident weights.


# --------------------------------------------------------------------------
# Fused forward pass: single pallas_call for the whole MLP.
# --------------------------------------------------------------------------
def mlp_forward(x, prepared, *, batch_tile=_MAX_BATCH_TILE,
                single_buffer_params=True):
    weights = prepared["weights"]
    biases = prepared["biases"]
    relu_flags = prepared["relu_flags"]
    in_dim = prepared["input_dim"]
    out_dim = prepared["output_dim"]
    n_layers = len(weights)

    B, K0 = x.shape
    assert K0 == in_dim

    tb = _choose_batch_tile(B, batch_tile)
    grid = (pl.cdiv(B, tb),)

    def resident_spec(shape):
        # Constant block index across the grid -> params stay VMEM-resident;
        # single-buffer them (the second pipeline buffer would be pure waste).
        idx = lambda i: (0,) * len(shape)
        if single_buffer_params:
            try:
                return pl.BlockSpec(shape, idx, pipeline_mode=pl.Buffered(1))
            except TypeError:
                pass
        return pl.BlockSpec(shape, idx)

    # x: unpadded f32, last block dim == full array dim (legal); cast to bf16
    # in-kernel. Output: unpadded (B, out_dim) f32 -> lean writeback, no slice.
    in_specs = [pl.BlockSpec((tb, K0), lambda i: (i, 0))]
    flat_wb = []
    for w, b in zip(weights, biases):
        in_specs.append(resident_spec(w.shape))
        in_specs.append(resident_spec(b.shape))
        flat_wb += [w, b]

    kernel = functools.partial(
        _fused_mlp_kernel, n_layers=n_layers, relu_flags=relu_flags)

    flops = 2 * B * sum(int(w.shape[0]) * int(w.shape[1]) for w in weights)
    bytes_accessed = (B * K0 * 4
                      + sum(int(w.size) * 2 for w in weights)
                      + sum(int(b.size) * 4 for b in biases)
                      + B * out_dim * 4)

    out = pl.pallas_call(
        kernel,
        out_shape=jax.ShapeDtypeStruct((B, out_dim), jnp.float32),
        grid_spec=pltpu.PrefetchScalarGridSpec(
            num_scalar_prefetch=0,
            grid=grid,
            in_specs=in_specs,
            out_specs=pl.BlockSpec((tb, out_dim), lambda i: (i, 0)),
        ),
        compiler_params=pltpu.CompilerParams(
            dimension_semantics=("parallel",),
            vmem_limit_bytes=_vmem_limit_bytes(
                weights, biases, tb, K0, out_dim, single_buffer_params),
        ),
        cost_estimate=pl.CostEstimate(
            flops=flops, transcendentals=0, bytes_accessed=bytes_accessed),
    )(x.astype(jnp.float32), *flat_wb)
    return out


if __name__ == "__main__":
    # Small shapes consistent with the module's forward.
    batch = 8
    input_dim = 16
    hidden_dim = 32
    output_dim = 8
    hidden_depth = 2

    key = jax.random.PRNGKey(0)
    kx, kp = jax.random.split(key)
    x = jax.random.normal(kx, (batch, input_dim), dtype=jnp.float32)

    params = init_mlp_params(kp, input_dim, hidden_dim, output_dim, hidden_depth)
    prepared = prepare_mlp_params(params)

    fwd = jax.jit(lambda xx: mlp_forward(xx, prepared))
    try:
        out = jax.block_until_ready(fwd(x))
    except Exception:
        # Safety net: retry with default (double-buffered) resident params in
        # case this jax build rejects pipeline_mode=pl.Buffered(1).
        fwd = jax.jit(lambda xx: mlp_forward(xx, prepared,
                                             single_buffer_params=False))
        out = jax.block_until_ready(fwd(x))

    assert out.shape == (batch, output_dim)

    # Reference 1: same arithmetic as the kernel (bf16 MXU inputs, f32 accum).
    ref16 = x
    for w_t, b, relu in params:
        ref16 = jnp.dot(ref16.astype(jnp.bfloat16), w_t.astype(jnp.bfloat16),
                        preferred_element_type=jnp.float32) + b
        if relu:
            ref16 = jnp.maximum(ref16, 0.0)
    assert jnp.allclose(out, ref16, atol=5e-3, rtol=5e-3), \
        "mismatch vs bf16-consistent reference"

    # Reference 2: full-f32 torch-equivalent math (loose tol due to bf16 MXU).
    ref32 = x
    for w_t, b, relu in params:
        ref32 = ref32 @ w_t + b
        if relu:
            ref32 = jnp.maximum(ref32, 0.0)
    assert jnp.allclose(out, ref32, atol=1e-1, rtol=1e-1), \
        "mismatch vs f32 reference"

    # TODO(synk): output_mod (arbitrary trailing nn.Module) is not translated;
    # only the default output_mod=None path is implemented.
    print("KERNEL_OK")
</pallas_src>

<mosaic_0001>
module attributes {stable_mosaic.version = 11 : i64} {
  func.func @_fused_mlp_kernel(%arg0: i32, %arg1: memref<8x16xf32, #tpu.memory_space<vmem>>, %arg2: memref<16x32xbf16, #tpu.memory_space<vmem>>, %arg3: memref<1x32xf32, #tpu.memory_space<vmem>>, %arg4: memref<32x32xbf16, #tpu.memory_space<vmem>>, %arg5: memref<1x32xf32, #tpu.memory_space<vmem>>, %arg6: memref<32x8xbf16, #tpu.memory_space<vmem>>, %arg7: memref<1x8xf32, #tpu.memory_space<vmem>>, %arg8: memref<8x8xf32, #tpu.memory_space<vmem>>) attributes {dimension_semantics = [#tpu.dimension_semantics<parallel>], iteration_bounds = array<i64: 1>, scalar_prefetch = 0 : i64, scratch_operands = 0 : i64, tpu.core_type = #tpu.core_type<tc>, window_params = [{transform_indices = @transform_0, window_bounds = array<i64: 8, 16>}, {pipeline_mode = #tpu.pipeline_mode<synchronous>, transform_indices = @transform_1, window_bounds = array<i64: 16, 32>}, {pipeline_mode = #tpu.pipeline_mode<synchronous>, transform_indices = @transform_2, window_bounds = array<i64: 1, 32>}, {pipeline_mode = #tpu.pipeline_mode<synchronous>, transform_indices = @transform_3, window_bounds = array<i64: 32, 32>}, {pipeline_mode = #tpu.pipeline_mode<synchronous>, transform_indices = @transform_4, window_bounds = array<i64: 1, 32>}, {pipeline_mode = #tpu.pipeline_mode<synchronous>, transform_indices = @transform_5, window_bounds = array<i64: 32, 8>}, {pipeline_mode = #tpu.pipeline_mode<synchronous>, transform_indices = @transform_6, window_bounds = array<i64: 1, 8>}, {transform_indices = @transform_7, window_bounds = array<i64: 8, 8>}]} {
    %c0 = arith.constant 0 : index
    %c0_0 = arith.constant 0 : index
    %0 = vector.load %arg1[%c0, %c0_0] : memref<8x16xf32, #tpu.memory_space<vmem>>, vector<8x16xf32>
    %1 = arith.truncf %0 : vector<8x16xf32> to vector<8x16xbf16>
    %c0_1 = arith.constant 0 : index
    %c0_2 = arith.constant 0 : index
    %2 = vector.load %arg2[%c0_1, %c0_2] : memref<16x32xbf16, #tpu.memory_space<vmem>>, vector<16x32xbf16>
    %c0_3 = arith.constant 0 : index
    %c0_4 = arith.constant 0 : index
    %3 = vector.load %arg3[%c0_3, %c0_4] : memref<1x32xf32, #tpu.memory_space<vmem>>, vector<1x32xf32>
    %cst = arith.constant dense<0.000000e+00> : vector<8x32xf32>
    %4 = tpu.matmul %1, %2, %cst {dimension_numbers = #tpu.dot_dimension_numbers<[1], [0], [0], [1], [0, 0, 1, 1], [], []>} : vector<8x16xbf16>, vector<16x32xbf16>, vector<8x32xf32> -> vector<8x32xf32>
    %5 = vector.broadcast %3 : vector<1x32xf32> to vector<8x32xf32>
    %6 = arith.addf %4, %5 : vector<8x32xf32>
    %cst_5 = arith.constant 0.000000e+00 : f32
    %7 = vector.broadcast %cst_5 : f32 to vector<8x32xf32>
    %8 = arith.maximumf %6, %7 : vector<8x32xf32>
    %9 = arith.truncf %8 : vector<8x32xf32> to vector<8x32xbf16>
    %c0_6 = arith.constant 0 : index
    %c0_7 = arith.constant 0 : index
    %10 = vector.load %arg4[%c0_6, %c0_7] : memref<32x32xbf16, #tpu.memory_space<vmem>>, vector<32x32xbf16>
    %c0_8 = arith.constant 0 : index
    %c0_9 = arith.constant 0 : index
    %11 = vector.load %arg5[%c0_8, %c0_9] : memref<1x32xf32, #tpu.memory_space<vmem>>, vector<1x32xf32>
    %cst_10 = arith.constant dense<0.000000e+00> : vector<8x32xf32>
    %12 = tpu.matmul %9, %10, %cst_10 {dimension_numbers = #tpu.dot_dimension_numbers<[1], [0], [0], [1], [0, 0, 1, 1], [], []>} : vector<8x32xbf16>, vector<32x32xbf16>, vector<8x32xf32> -> vector<8x32xf32>
    %13 = vector.broadcast %11 : vector<1x32xf32> to vector<8x32xf32>
    %14 = arith.addf %12, %13 : vector<8x32xf32>
    %cst_11 = arith.constant 0.000000e+00 : f32
    %15 = vector.broadcast %cst_11 : f32 to vector<8x32xf32>
    %16 = arith.maximumf %14, %15 : vector<8x32xf32>
    %17 = arith.truncf %16 : vector<8x32xf32> to vector<8x32xbf16>
    %c0_12 = arith.constant 0 : index
    %c0_13 = arith.constant 0 : index
    %18 = vector.load %arg6[%c0_12, %c0_13] : memref<32x8xbf16, #tpu.memory_space<vmem>>, vector<32x8xbf16>
    %c0_14 = arith.constant 0 : index
    %c0_15 = arith.constant 0 : index
    %19 = vector.load %arg7[%c0_14, %c0_15] : memref<1x8xf32, #tpu.memory_space<vmem>>, vector<1x8xf32>
    %cst_16 = arith.constant dense<0.000000e+00> : vector<8x8xf32>
    %20 = tpu.matmul %17, %18, %cst_16 {dimension_numbers = #tpu.dot_dimension_numbers<[1], [0], [0], [1], [0, 0, 1, 1], [], []>} : vector<8x32xbf16>, vector<32x8xbf16>, vector<8x8xf32> -> vector<8x8xf32>
    %21 = vector.broadcast %19 : vector<1x8xf32> to vector<8x8xf32>
    %22 = arith.addf %20, %21 : vector<8x8xf32>
    %c0_17 = arith.constant 0 : index
    %c0_18 = arith.constant 0 : index
    %23 = vector.load %arg8[%c0_17, %c0_18] : memref<8x8xf32, #tpu.memory_space<vmem>>, vector<8x8xf32>
    tpu.vector_store %arg8[%c0_17, %c0_18], %22 {strides = array<i32>} : memref<8x8xf32, #tpu.memory_space<vmem>>, vector<8x8xf32>,
    return
  }
  func.func @transform_0(%arg0: i32) -> (i32, i32) {
    %c0_i32 = arith.constant 0 : i32
    %c0_i32_0 = arith.constant 0 : i32
    return %arg0, %c0_i32 : i32, i32
  }
  func.func @transform_1(%arg0: i32) -> (i32, i32) {
    %c0_i32 = arith.constant 0 : i32
    %c0_i32_0 = arith.constant 0 : i32
    %c0_i32_1 = arith.constant 0 : i32
    return %c0_i32, %c0_i32_0 : i32, i32
  }
  func.func @transform_2(%arg0: i32) -> (i32, i32) {
    %c0_i32 = arith.constant 0 : i32
    %c0_i32_0 = arith.constant 0 : i32
    %c0_i32_1 = arith.constant 0 : i32
    return %c0_i32, %c0_i32_0 : i32, i32
  }
  func.func @transform_3(%arg0: i32) -> (i32, i32) {
    %c0_i32 = arith.constant 0 : i32
    %c0_i32_0 = arith.constant 0 : i32
    %c0_i32_1 = arith.constant 0 : i32
    return %c0_i32, %c0_i32_0 : i32, i32
  }
  func.func @transform_4(%arg0: i32) -> (i32, i32) {
    %c0_i32 = arith.constant 0 : i32
    %c0_i32_0 = arith.constant 0 : i32
    %c0_i32_1 = arith.constant 0 : i32
    return %c0_i32, %c0_i32_0 : i32, i32
  }
  func.func @transform_5(%arg0: i32) -> (i32, i32) {
    %c0_i32 = arith.constant 0 : i32
    %c0_i32_0 = arith.constant 0 : i32
    %c0_i32_1 = arith.constant 0 : i32
    return %c0_i32, %c0_i32_0 : i32, i32
  }
  func.func @transform_6(%arg0: i32) -> (i32, i32) {
    %c0_i32 = arith.constant 0 : i32
    %c0_i32_0 = arith.constant 0 : i32
    %c0_i32_1 = arith.constant 0 : i32
    return %c0_i32, %c0_i32_0 : i32, i32
  }
  func.func @transform_7(%arg0: i32) -> (i32, i32) {
    %c0_i32 = arith.constant 0 : i32
    %c0_i32_0 = arith.constant 0 : i32
    return %arg0, %c0_i32 : i32, i32
  }
}

module attributes {stable_mosaic.version = 11 : i64} {
  func.func @_fused_mlp_kernel(%arg0: i32, %arg1: memref<8x16xf32, #tpu.memory_space<vmem>>, %arg2: memref<16x32xbf16, #tpu.memory_space<vmem>>, %arg3: memref<1x32xf32, #tpu.memory_space<vmem>>, %arg4: memref<32x32xbf16, #tpu.memory_space<vmem>>, %arg5: memref<1x32xf32, #tpu.memory_space<vmem>>, %arg6: memref<32x8xbf16, #tpu.memory_space<vmem>>, %arg7: memref<1x8xf32, #tpu.memory_space<vmem>>, %arg8: memref<8x8xf32, #tpu.memory_space<vmem>>) attributes {dimension_semantics = [#tpu.dimension_semantics<parallel>], iteration_bounds = array<i64: 1>, scalar_prefetch = 0 : i64, scratch_operands = 0 : i64, tpu.core_type = #tpu.core_type<tc>, window_params = [{transform_indices = @transform_0, window_bounds = array<i64: 8, 16>}, {pipeline_mode = #tpu.pipeline_mode<synchronous>, transform_indices = @transform_1, window_bounds = array<i64: 16, 32>}, {pipeline_mode = #tpu.pipeline_mode<synchronous>, transform_indices = @transform_2, window_bounds = array<i64: 1, 32>}, {pipeline_mode = #tpu.pipeline_mode<synchronous>, transform_indices = @transform_3, window_bounds = array<i64: 32, 32>}, {pipeline_mode = #tpu.pipeline_mode<synchronous>, transform_indices = @transform_4, window_bounds = array<i64: 1, 32>}, {pipeline_mode = #tpu.pipeline_mode<synchronous>, transform_indices = @transform_5, window_bounds = array<i64: 32, 8>}, {pipeline_mode = #tpu.pipeline_mode<synchronous>, transform_indices = @transform_6, window_bounds = array<i64: 1, 8>}, {transform_indices = @transform_7, window_bounds = array<i64: 8, 8>}]} {
    %c0 = arith.constant 0 : index
    %c0_0 = arith.constant 0 : index
    %0 = vector.load %arg1[%c0, %c0_0] : memref<8x16xf32, #tpu.memory_space<vmem>>, vector<8x16xf32>
    %1 = arith.truncf %0 : vector<8x16xf32> to vector<8x16xbf16>
    %c0_1 = arith.constant 0 : index
    %c0_2 = arith.constant 0 : index
    %2 = vector.load %arg2[%c0_1, %c0_2] : memref<16x32xbf16, #tpu.memory_space<vmem>>, vector<16x32xbf16>
    %c0_3 = arith.constant 0 : index
    %c0_4 = arith.constant 0 : index
    %3 = vector.load %arg3[%c0_3, %c0_4] : memref<1x32xf32, #tpu.memory_space<vmem>>, vector<1x32xf32>
    %cst = arith.constant dense<0.000000e+00> : vector<8x32xf32>
    %4 = tpu.matmul %1, %2, %cst {dimension_numbers = #tpu.dot_dimension_numbers<[1], [0], [0], [1], [0, 0, 1, 1], [], []>} : vector<8x16xbf16>, vector<16x32xbf16>, vector<8x32xf32> -> vector<8x32xf32>
    %5 = vector.broadcast %3 : vector<1x32xf32> to vector<8x32xf32>
    %6 = arith.addf %4, %5 : vector<8x32xf32>
    %cst_5 = arith.constant 0.000000e+00 : f32
    %7 = vector.broadcast %cst_5 : f32 to vector<8x32xf32>
    %8 = arith.maximumf %6, %7 : vector<8x32xf32>
    %9 = arith.truncf %8 : vector<8x32xf32> to vector<8x32xbf16>
    %c0_6 = arith.constant 0 : index
    %c0_7 = arith.constant 0 : index
    %10 = vector.load %arg4[%c0_6, %c0_7] : memref<32x32xbf16, #tpu.memory_space<vmem>>, vector<32x32xbf16>
    %c0_8 = arith.constant 0 : index
    %c0_9 = arith.constant 0 : index
    %11 = vector.load %arg5[%c0_8, %c0_9] : memref<1x32xf32, #tpu.memory_space<vmem>>, vector<1x32xf32>
    %cst_10 = arith.constant dense<0.000000e+00> : vector<8x32xf32>
    %12 = tpu.matmul %9, %10, %cst_10 {dimension_numbers = #tpu.dot_dimension_numbers<[1], [0], [0], [1], [0, 0, 1, 1], [], []>} : vector<8x32xbf16>, vector<32x32xbf16>, vector<8x32xf32> -> vector<8x32xf32>
    %13 = vector.broadcast %11 : vector<1x32xf32> to vector<8x32xf32>
    %14 = arith.addf %12, %13 : vector<8x32xf32>
    %cst_11 = arith.constant 0.000000e+00 : f32
    %15 = vector.broadcast %cst_11 : f32 to vector<8x32xf32>
    %16 = arith.maximumf %14, %15 : vector<8x32xf32>
    %17 = arith.truncf %16 : vector<8x32xf32> to vector<8x32xbf16>
    %c0_12 = arith.constant 0 : index
    %c0_13 = arith.constant 0 : index
    %18 = vector.load %arg6[%c0_12, %c0_13] : memref<32x8xbf16, #tpu.memory_space<vmem>>, vector<32x8xbf16>
    %c0_14 = arith.constant 0 : index
    %c0_15 = arith.constant 0 : index
    %19 = vector.load %arg7[%c0_14, %c0_15] : memref<1x8xf32, #tpu.memory_space<vmem>>, vector<1x8xf32>
    %cst_16 = arith.constant dense<0.000000e+00> : vector<8x8xf32>
    %20 = tpu.matmul %17, %18, %cst_16 {dimension_numbers = #tpu.dot_dimension_numbers<[1], [0], [0], [1], [0, 0, 1, 1], [], []>} : vector<8x32xbf16>, vector<32x8xbf16>, vector<8x8xf32> -> vector<8x8xf32>
    %21 = vector.broadcast %19 : vector<1x8xf32> to vector<8x8xf32>
    %22 = arith.addf %20, %21 : vector<8x8xf32>
    %c0_17 = arith.constant 0 : index
    %c0_18 = arith.constant 0 : index
    %23 = vector.load %arg8[%c0_17, %c0_18] : memref<8x8xf32, #tpu.memory_space<vmem>>, vector<8x8xf32>
    tpu.vector_store %arg8[%c0_17, %c0_18], %22 {strides = array<i32>} : memref<8x8xf32, #tpu.memory_space<vmem>>, vector<8x8xf32>,
    return
  }
  func.func @transform_0(%arg0: i32) -> (i32, i32) {
    %c0_i32 = arith.constant 0 : i32
    %c0_i32_0 = arith.constant 0 : i32
    return %arg0, %c0_i32 : i32, i32
  }
  func.func @transform_1(%arg0: i32) -> (i32, i32) {
    %c0_i32 = arith.constant 0 : i32
    %c0_i32_0 = arith.constant 0 : i32
    %c0_i32_1 = arith.constant 0 : i32
    return %c0_i32, %c0_i32_0 : i32, i32
  }
  func.func @transform_2(%arg0: i32) -> (i32, i32) {
    %c0_i32 = arith.constant 0 : i32
    %c0_i32_0 = arith.constant 0 : i32
    %c0_i32_1 = arith.constant 0 : i32
    return %c0_i32, %c0_i32_0 : i32, i32
  }
  func.func @transform_3(%arg0: i32) -> (i32, i32) {
    %c0_i32 = arith.constant 0 : i32
    %c0_i32_0 = arith.constant 0 : i32
    %c0_i32_1 = arith.constant 0 : i32
    return %c0_i32, %c0_i32_0 : i32, i32
  }
  func.func @transform_4(%arg0: i32) -> (i32, i32) {
    %c0_i32 = arith.constant 0 : i32
    %c0_i32_0 = arith.constant 0 : i32
    %c0_i32_1 = arith.constant 0 : i32
    return %c0_i32, %c0_i32_0 : i32, i32
  }
  func.func @transform_5(%arg0: i32) -> (i32, i32) {
    %c0_i32 = arith.constant 0 : i32
    %c0_i32_0 = arith.constant 0 : i32
    %c0_i32_1 = arith.constant 0 : i32
    return %c0_i32, %c0_i32_0 : i32, i32
  }
  func.func @transform_6(%arg0: i32) -> (i32, i32) {
    %c0_i32 = arith.constant 0 : i32
    %c0_i32_0 = arith.constant 0 : i32
    %c0_i32_1 = arith.constant 0 : i32
    return %c0_i32, %c0_i32_0 : i32, i32
  }
  func.func @transform_7(%arg0: i32) -> (i32, i32) {
    %c0_i32 = arith.constant 0 : i32
    %c0_i32_0 = arith.constant 0 : i32
    return %arg0, %c0_i32 : i32, i32
  }
}

</mosaic_0001>

<bundles_post_ra>
// kernel: _lambda_.1
= control target key start
LH: loop header
LB: loop body
LE: loop exit
PB: predicated region body
PF: predicated region fallthrough
CT: control target
= control target key end

     0   :  { %12 = vsyncpa [#allocation3], 0  ;;  %s498_s0 = inlined_call_operand.vmem [shape: f32[8,16], index: 0, kind: input, shape index: {}]   ;;  %s499_s1 = inlined_call_operand.hbm [shape: bf16[16,32], index: 1, kind: input, shape index: {}]   ;;  %s500_s2 = inlined_call_operand.vmem [shape: f32[1,32], index: 2, kind: input, shape index: {}, may-alias: {2,4}]   ;;  %s501_s3 = inlined_call_operand.hbm [shape: bf16[32,32], index: 3, kind: input, shape index: {}]   ;;  %s502_s4 = inlined_call_operand.vmem [shape: f32[1,32], index: 4, kind: input, shape index: {}, may-alias: {2,4}]   ;;  %s503_s5 = inlined_call_operand.vmem [shape: bf16[32,8], index: 5, kind: input, shape index: {}]   ;;  %s504_s6 = inlined_call_operand.vmem [shape: f32[1,8], index: 6, kind: input, shape index: {}]   ;;  %s505_s7 = inlined_call_operand.hbm [shape: f32[8,8], index: 7, kind: output, shape index: {}]  }
   0x1   :  { %13 = vsyncpa [#allocation6], 0 }
   0x2   :  { %14 = vsyncpa [#allocation4], 0  ;;  %s397_s24 = smov [#allocation2]   ;;  %s325_s28 = scalar_lea.hbm %s499_s1, 128 }
   0x3   :  { %s22_s25 = sshll.u32 %s397_s24, 4  ;;  %p326_p0 = scmp.ne.s32.totalorder %s499_s1, %s325_s28  ;;  %s23_s25 = int_to_ptr.vmem [resolvable:$true] %s22_s25 }
   0x4   :  { %p329_p1 = scmp.lt.u32.totalorder %s325_s28, %s499_s1 }
   0x6   :  { %p331_p2 = pnand %p329_p1, %p326_p0 }
   0x8   :  { %334 = shalt.err (!%p331_p2)
}
   0x9   :  { %s335_s10 = scalar_lea.vmem %s23_s25, 128  ;;  %p340_p4 = scmp.lt.s32.totalorder %s23_s25, %s23_s25 }
   0xa   :  { %p336_p3 = scmp.ne.s32.totalorder %s23_s25, %s335_s10  ;;  %p341_p5 = scmp.lt.s32.totalorder %s335_s10, %s335_s10 }
   0xc   :  { %p342_p6 = por %p341_p5, %p340_p4 }
   0xe   :  { %p343_p7 = pnand %p342_p6, %p336_p3 }
  0x10   :  { %346 = shalt.err (!%p343_p7)
}
  0x11   :  { %s398_s11 = smov 64   ;;  %s399_s12 = smov 4  }
  0x12   :  { %28 = dma.hbm_to_vmem [thread:$0]  %s499_s1, 128, %s23_s25, [#allocation3], %s398_s11, %s398_s11, %s399_s12  }
  0x13   :  { %s400_s15 = smov [#allocation5]   ;;  %s347_s19 = scalar_lea.hbm %s501_s3, 256 }
  0x14   :  { %s36_s16 = sshll.u32 %s400_s15, 4  ;;  %p348_p8 = scmp.ne.s32.totalorder %s501_s3, %s347_s19  ;;  %s37_s16 = int_to_ptr.vmem [resolvable:$true] %s36_s16 }
  0x15   :  { %p351_p9 = scmp.lt.u32.totalorder %s347_s19, %s501_s3 }
  0x17   :  { %p353_p10 = pnand %p351_p9, %p348_p8 }
  0x19   :  { %356 = shalt.err (!%p353_p10)
}
  0x1a   :  { %s357_s24 = scalar_lea.vmem %s37_s16, 256  ;;  %p362_p12 = scmp.lt.s32.totalorder %s37_s16, %s37_s16 }
  0x1b   :  { %p358_p11 = scmp.ne.s32.totalorder %s37_s16, %s357_s24  ;;  %p363_p13 = scmp.lt.s32.totalorder %s357_s24, %s357_s24 }
  0x1d   :  { %p364_p0 = por %p363_p13, %p362_p12 }
  0x1f   :  { %p365_p1 = pnand %p364_p0, %p358_p11 }
  0x21   :  { %368 = shalt.err (!%p365_p1)
}
  0x22   :  { %42 = dma.hbm_to_vmem [thread:$0]  %s501_s3, 256, %s37_s16, [#allocation6], %s398_s11, %s398_s11, %s399_s12  }
  0x23   :  { %391 = dma.done.wait [#allocation3], 128  }
  0x24   :  { %392 = vsyncadd [#allocation3], 4294967168 }
  0x25   :  { %393 = dma.done.wait [#allocation6], 256  }
  0x26   :  { %394 = vsyncadd [#allocation6], 4294967040  ;;  %v401_v0 = vmov 0.0   ;;  %vm402_vm0 = vmmov 0   ;;  %v320_v1 = vld [vmem:[#allocation2] sm:$0xff]   ;;  %vm73_vm1 = vcmask 130048  }
  0x27   :  { %291 = vmatprep.subr.bf16.mxu0 %v401_v0  ;;  %293 = vmatprep.mubr.msk.bf16.mxu0 %vm402_vm0, %v401_v0  ;;  %v56_v2 = vld [vmem:[%s498_s0] sm:$0xff]  ;;  %v321_v4 = vld [vmem:[#allocation5] sm:$0xff]   ;;  %v322_v5 = vld [vmem:[#allocation5 + $0x8] sm:$0xff]   ;;  %vm142_vm2 = vcmask 261120   ;;  %s403_s12 = smov [#allocation7]   ;;  %vm254_vm3 = vcmask 64512  }
  0x28   :  { %297 = vmatprep.subr.bf16.mxu1 %v401_v0  ;;  %301 = vmatprep.mubr.msk.bf16.mxu1 %vm402_vm0, %v401_v0  ;;  %v57_v3 = vpack.c.bf16 %v56_v2, %v56_v2  ;;  %v323_v6 = vld [vmem:[%s503_s5] sm:$0xff]   ;;  %v324_v15 = vld [vmem:[%s503_s5 + $0x8] sm:$0xff]   ;;  %s262_s13 = sshll.u32 %s403_s12, 4  ;;  %s263_s13 = int_to_ptr.vmem [resolvable:$true] %s262_s13 }
  0x29   :  { %292 = vmatpush3.bf16.msra.mxu0 %v320_v1  ;;  %298 = vmatpush3.bf16.msra.mxu1 %v321_v4  ;;  %v272_v7 = vld [vmem:[%s500_s2] ss:$0 sm:$0xff]  ;;  %p374_p3 = scmp.lt.s32.totalorder %s263_s13, %s263_s13 }
  0x2a   :  { %305 = vmatprep.subr.bf16.mxu0 %v401_v0  ;;  %299 = vmatprep.subr.bf16.mxu1 %v401_v0  ;;  %v275_v16 = vld [vmem:[%s502_s4] ss:$0 sm:$0xff]  ;;  %s369_s4 = scalar_lea.vmem %s263_s13, 128 }
  0x2b   :  { %v279_v24 = vld [vmem:[%s504_s6] ss:$0 sm:$0xff]  ;;  %p370_p2 = scmp.ne.s32.totalorder %s263_s13, %s369_s4  ;;  %p375_p4 = scmp.lt.s32.totalorder %s369_s4, %s369_s4 }
  0x2c   :  { %294 = vmatmul.mubr.msk.bf16.vlgmr.msra.gmra.mrb[0].mxu0 %vm73_vm1, %v57_v3 }
  0x2d   :  { %309 = vmatprep.mubr.msk.bf16.mxu0 %vm402_vm0, %v401_v0  ;;  %300 = vmatpush3.bf16.msra.mxu1 %v322_v5  ;;  %p376_p5 = por %p375_p4, %p374_p3 }
  0x2e   :  { %306 = vmatpush3.bf16.msra.mxu0 %v323_v6 }
  0x2f   :  { %307 = vmatprep.subr.bf16.mxu0 %v401_v0  ;;  %p377_p6 = pnand %p376_p5, %p370_p2 }
  0x32   :  { %308 = vmatpush3.bf16.msra.mxu0 %v324_v15 }
  0xff   :  { %v111_v8 = vpop.f32.mrb[0].mxu0 }
 0x100   :  { %v112_v9 = vadd.f32 %v272_v7, %v111_v8  ;;  %v295_v10 = vpop.f32.mrb[1].mxu0 }
 0x101   :  { %v114_v11 = vpop.f32.mrb[2].mxu0 }
 0x102   :  { %v117_v12 = vmax.f32 %v112_v9, 0.0  ;;  %v296_v13 = vpop.f32.mrb[3].mxu0 }
 0x104   :  { %v118_v14 = vpack.c.bf16 %v117_v12, %v117_v12 }
 0x106   :  { %302 = vmatmul.mubr.msk.bf16.vlgmr.msra.gmra.mrb[0].mxu1 %vm142_vm2, %v118_v14 }
 0x1d9   :  { %v180_v17 = vpop.f32.mrb[0].mxu1 }
 0x1da   :  { %v181_v18 = vadd.f32 %v275_v16, %v180_v17  ;;  %v303_v19 = vpop.f32.mrb[1].mxu1 }
 0x1db   :  { %v183_v20 = vpop.f32.mrb[2].mxu1 }
 0x1dc   :  { %v186_v21 = vmax.f32 %v181_v18, 0.0  ;;  %v304_v22 = vpop.f32.mrb[3].mxu1 }
 0x1de   :  { %v187_v23 = vpack.c.bf16 %v186_v21, %v186_v21 }
 0x1e0   :  { %310 = vmatmul.mubr.msk.bf16.vlgmr.msra.gmra.mrb[4].mxu0 %vm142_vm2, %v187_v23 }
 0x2b3   :  { %v248_v25 = vpop.f32.mrb[4].mxu0 }
 0x2b4   :  { %v249_v26 = vadd.f32 %v279_v24, %v248_v25  ;;  %v311_v27 = vpop.f32.mrb[5].mxu0 }
 0x2b5   :  { %v251_v28 = vpop.f32.mrb[6].mxu0 }
 0x2b6   :  { %v312_v29 = vpop.f32.mrb[7].mxu0  ;;  %255 = vst.msk [vmem:[#allocation7] sm:$0xff] %vm254_vm3, %v249_v26 }
 0x2b7   :  { %380 = shalt.err (!%p377_p6)
}
 0x2b8   :  { %s381_s6 = scalar_lea.hbm %s505_s7, 128 }
 0x2b9   :  { %p382_p7 = scmp.ne.s32.totalorder %s505_s7, %s381_s6  ;;  %p385_p8 = scmp.lt.u32.totalorder %s381_s6, %s505_s7 }
 0x2bb   :  { %p387_p9 = pnand %p385_p8, %p382_p7 }
 0x2bd   :  { %390 = shalt.err (!%p387_p9)
}
 0x2be   :  { %265 = dma.vmem_to_hbm [thread:$0]  %s263_s13, 128, %s505_s7, [#allocation4]  }
 0x2bf   :  { %395 = dma.done.wait [#allocation4], 128  }
 0x2c0   :  { %396 = vsyncadd [#allocation4], 4294967168 }
 0x2c1   :  { %269 = vsyncpa [#allocation3], 1 }
 0x2c2   :  { %270 = vsyncpa [#allocation6], 1 }
 0x2c3   :  { %271 = vsyncpa [#allocation4], 1 }

// kernel: _lambda_.1
= control target key start
LH: loop header
LB: loop body
LE: loop exit
PB: predicated region body
PF: predicated region fallthrough
CT: control target
= control target key end

     0   :  { %12 = vsyncpa [#allocation3], 0  ;;  %s498_s0 = inlined_call_operand.vmem [shape: f32[8,16], index: 0, kind: input, shape index: {}]   ;;  %s499_s1 = inlined_call_operand.hbm [shape: bf16[16,32], index: 1, kind: input, shape index: {}]   ;;  %s500_s2 = inlined_call_operand.vmem [shape: f32[1,32], index: 2, kind: input, shape index: {}, may-alias: {2,4}]   ;;  %s501_s3 = inlined_call_operand.hbm [shape: bf16[32,32], index: 3, kind: input, shape index: {}]   ;;  %s502_s4 = inlined_call_operand.vmem [shape: f32[1,32], index: 4, kind: input, shape index: {}, may-alias: {2,4}]   ;;  %s503_s5 = inlined_call_operand.vmem [shape: bf16[32,8], index: 5, kind: input, shape index: {}]   ;;  %s504_s6 = inlined_call_operand.vmem [shape: f32[1,8], index: 6, kind: input, shape index: {}]   ;;  %s505_s7 = inlined_call_operand.hbm [shape: f32[8,8], index: 7, kind: output, shape index: {}]  }
   0x1   :  { %13 = vsyncpa [#allocation6], 0 }
   0x2   :  { %14 = vsyncpa [#allocation4], 0  ;;  %s397_s24 = smov [#allocation2]   ;;  %s325_s28 = scalar_lea.hbm %s499_s1, 128 }
   0x3   :  { %s22_s25 = sshll.u32 %s397_s24, 4  ;;  %p326_p0 = scmp.ne.s32.totalorder %s499_s1, %s325_s28  ;;  %s23_s25 = int_to_ptr.vmem [resolvable:$true] %s22_s25 }
   0x4   :  { %p329_p1 = scmp.lt.u32.totalorder %s325_s28, %s499_s1 }
   0x6   :  { %p331_p2 = pnand %p329_p1, %p326_p0 }
   0x8   :  { %334 = shalt.err (!%p331_p2)
}
   0x9   :  { %s335_s10 = scalar_lea.vmem %s23_s25, 128  ;;  %p340_p4 = scmp.lt.s32.totalorder %s23_s25, %s23_s25 }
   0xa   :  { %p336_p3 = scmp.ne.s32.totalorder %s23_s25, %s335_s10  ;;  %p341_p5 = scmp.lt.s32.totalorder %s335_s10, %s335_s10 }
   0xc   :  { %p342_p6 = por %p341_p5, %p340_p4 }
   0xe   :  { %p343_p7 = pnand %p342_p6, %p336_p3 }
  0x10   :  { %346 = shalt.err (!%p343_p7)
}
  0x11   :  { %s398_s11 = smov 64   ;;  %s399_s12 = smov 4  }
  0x12   :  { %28 = dma.hbm_to_vmem [thread:$0]  %s499_s1, 128, %s23_s25, [#allocation3], %s398_s11, %s398_s11, %s399_s12  }
  0x13   :  { %s400_s15 = smov [#allocation5]   ;;  %s347_s19 = scalar_lea.hbm %s501_s3, 256 }
  0x14   :  { %s36_s16 = sshll.u32 %s400_s15, 4  ;;  %p348_p8 = scmp.ne.s32.totalorder %s501_s3, %s347_s19  ;;  %s37_s16 = int_to_ptr.vmem [resolvable:$true] %s36_s16 }
  0x15   :  { %p351_p9 = scmp.lt.u32.totalorder %s347_s19, %s501_s3 }
  0x17   :  { %p353_p10 = pnand %p351_p9, %p348_p8 }
  0x19   :  { %356 = shalt.err (!%p353_p10)
}
  0x1a   :  { %s357_s24 = scalar_lea.vmem %s37_s16, 256  ;;  %p362_p12 = scmp.lt.s32.totalorder %s37_s16, %s37_s16 }
  0x1b   :  { %p358_p11 = scmp.ne.s32.totalorder %s37_s16, %s357_s24  ;;  %p363_p13 = scmp.lt.s32.totalorder %s357_s24, %s357_s24 }
  0x1d   :  { %p364_p0 = por %p363_p13, %p362_p12 }
  0x1f   :  { %p365_p1 = pnand %p364_p0, %p358_p11 }
  0x21   :  { %368 = shalt.err (!%p365_p1)
}
  0x22   :  { %42 = dma.hbm_to_vmem [thread:$0]  %s501_s3, 256, %s37_s16, [#allocation6], %s398_s11, %s398_s11, %s399_s12  }
  0x23   :  { %391 = dma.done.wait [#allocation3], 128  }
  0x24   :  { %392 = vsyncadd [#allocation3], 4294967168 }
  0x25   :  { %393 = dma.done.wait [#allocation6], 256  }
  0x26   :  { %394 = vsyncadd [#allocation6], 4294967040  ;;  %v401_v0 = vmov 0.0   ;;  %vm402_vm0 = vmmov 0   ;;  %v320_v1 = vld [vmem:[#allocation2] sm:$0xff]   ;;  %vm73_vm1 = vcmask 130048  }
  0x27   :  { %291 = vmatprep.subr.bf16.mxu0 %v401_v0  ;;  %293 = vmatprep.mubr.msk.bf16.mxu0 %vm402_vm0, %v401_v0  ;;  %v56_v2 = vld [vmem:[%s498_s0] sm:$0xff]  ;;  %v321_v4 = vld [vmem:[#allocation5] sm:$0xff]   ;;  %v322_v5 = vld [vmem:[#allocation5 + $0x8] sm:$0xff]   ;;  %vm142_vm2 = vcmask 261120   ;;  %s403_s12 = smov [#allocation7]   ;;  %vm254_vm3 = vcmask 64512  }
  0x28   :  { %297 = vmatprep.subr.bf16.mxu1 %v401_v0  ;;  %301 = vmatprep.mubr.msk.bf16.mxu1 %vm402_vm0, %v401_v0  ;;  %v57_v3 = vpack.c.bf16 %v56_v2, %v56_v2  ;;  %v323_v6 = vld [vmem:[%s503_s5] sm:$0xff]   ;;  %v324_v15 = vld [vmem:[%s503_s5 + $0x8] sm:$0xff]   ;;  %s262_s13 = sshll.u32 %s403_s12, 4  ;;  %s263_s13 = int_to_ptr.vmem [resolvable:$true] %s262_s13 }
  0x29   :  { %292 = vmatpush3.bf16.msra.mxu0 %v320_v1  ;;  %298 = vmatpush3.bf16.msra.mxu1 %v321_v4  ;;  %v272_v7 = vld [vmem:[%s500_s2] ss:$0 sm:$0xff]  ;;  %p374_p3 = scmp.lt.s32.totalorder %s263_s13, %s263_s13 }
  0x2a   :  { %305 = vmatprep.subr.bf16.mxu0 %v401_v0  ;;  %299 = vmatprep.subr.bf16.mxu1 %v401_v0  ;;  %v275_v16 = vld [vmem:[%s502_s4] ss:$0 sm:$0xff]  ;;  %s369_s4 = scalar_lea.vmem %s263_s13, 128 }
  0x2b   :  { %v279_v24 = vld [vmem:[%s504_s6] ss:$0 sm:$0xff]  ;;  %p370_p2 = scmp.ne.s32.totalorder %s263_s13, %s369_s4  ;;  %p375_p4 = scmp.lt.s32.totalorder %s369_s4, %s369_s4 }
  0x2c   :  { %294 = vmatmul.mubr.msk.bf16.vlgmr.msra.gmra.mrb[0].mxu0 %vm73_vm1, %v57_v3 }
  0x2d   :  { %309 = vmatprep.mubr.msk.bf16.mxu0 %vm402_vm0, %v401_v0  ;;  %300 = vmatpush3.bf16.msra.mxu1 %v322_v5  ;;  %p376_p5 = por %p375_p4, %p374_p3 }
  0x2e   :  { %306 = vmatpush3.bf16.msra.mxu0 %v323_v6 }
  0x2f   :  { %307 = vmatprep.subr.bf16.mxu0 %v401_v0  ;;  %p377_p6 = pnand %p376_p5, %p370_p2 }
  0x32   :  { %308 = vmatpush3.bf16.msra.mxu0 %v324_v15 }
  0xff   :  { %v111_v8 = vpop.f32.mrb[0].mxu0 }
 0x100   :  { %v112_v9 = vadd.f32 %v272_v7, %v111_v8  ;;  %v295_v10 = vpop.f32.mrb[1].mxu0 }
 0x101   :  { %v114_v11 = vpop.f32.mrb[2].mxu0 }
 0x102   :  { %v117_v12 = vmax.f32 %v112_v9, 0.0  ;;  %v296_v13 = vpop.f32.mrb[3].mxu0 }
 0x104   :  { %v118_v14 = vpack.c.bf16 %v117_v12, %v117_v12 }
 0x106   :  { %302 = vmatmul.mubr.msk.bf16.vlgmr.msra.gmra.mrb[0].mxu1 %vm142_vm2, %v118_v14 }
 0x1d9   :  { %v180_v17 = vpop.f32.mrb[0].mxu1 }
 0x1da   :  { %v181_v18 = vadd.f32 %v275_v16, %v180_v17  ;;  %v303_v19 = vpop.f32.mrb[1].mxu1 }
 0x1db   :  { %v183_v20 = vpop.f32.mrb[2].mxu1 }
 0x1dc   :  { %v186_v21 = vmax.f32 %v181_v18, 0.0  ;;  %v304_v22 = vpop.f32.mrb[3].mxu1 }
 0x1de   :  { %v187_v23 = vpack.c.bf16 %v186_v21, %v186_v21 }
 0x1e0   :  { %310 = vmatmul.mubr.msk.bf16.vlgmr.msra.gmra.mrb[4].mxu0 %vm142_vm2, %v187_v23 }
 0x2b3   :  { %v248_v25 = vpop.f32.mrb[4].mxu0 }
 0x2b4   :  { %v249_v26 = vadd.f32 %v279_v24, %v248_v25  ;;  %v311_v27 = vpop.f32.mrb[5].mxu0 }
 0x2b5   :  { %v251_v28 = vpop.f32.mrb[6].mxu0 }
 0x2b6   :  { %v312_v29 = vpop.f32.mrb[7].mxu0  ;;  %255 = vst.msk [vmem:[#allocation7] sm:$0xff] %vm254_vm3, %v249_v26 }
 0x2b7   :  { %380 = shalt.err (!%p377_p6)
}
 0x2b8   :  { %s381_s6 = scalar_lea.hbm %s505_s7, 128 }
 0x2b9   :  { %p382_p7 = scmp.ne.s32.totalorder %s505_s7, %s381_s6  ;;  %p385_p8 = scmp.lt.u32.totalorder %s381_s6, %s505_s7 }
 0x2bb   :  { %p387_p9 = pnand %p385_p8, %p382_p7 }
 0x2bd   :  { %390 = shalt.err (!%p387_p9)
}
 0x2be   :  { %265 = dma.vmem_to_hbm [thread:$0]  %s263_s13, 128, %s505_s7, [#allocation4]  }
 0x2bf   :  { %395 = dma.done.wait [#allocation4], 128  }
 0x2c0   :  { %396 = vsyncadd [#allocation4], 4294967168 }
 0x2c1   :  { %269 = vsyncpa [#allocation3], 1 }
 0x2c2   :  { %270 = vsyncpa [#allocation6], 1 }
 0x2c3   :  { %271 = vsyncpa [#allocation4], 1 }

</bundles_post_ra>
